<compile_context>
chip_gen: v6e
topology: v6e:2x2x1
jax: 0.10.0
libtpu: 0.0.40
codegen_flags: <defaults>
</compile_context>

<pallas_src>
import jax
import jax.numpy as jnp
from jax import lax
from jax.experimental import pallas as pl
from jax.experimental.pallas import tpu as pltpu

LEAKY_SLOPE = 0.1                 # Darknet-style leaky ReLU
VMEM_LIMIT = 32 * 1024 * 1024     # safe on v5e/v6e/v7x; tiles here use only a few 10s of KiB


def _leaky(x):
    return jnp.where(x >= 0, x, LEAKY_SLOPE * x)


def _pick_tile(m):
    """Largest lane tile (multiple of 128) that divides m; fall back to the full extent."""
    for t in (1024, 512, 256, 128):
        if m % t == 0:
            return t
    return m


# ---------------------------------------------------------------------------
# Kernel 1: 1x1 conv (+ folded BN bias) + leaky on a lane-dense (Cin, M) slab.
# ---------------------------------------------------------------------------
def _pw_kernel(x_ref, w_ref, b_ref, o_ref):
    acc = jnp.dot(w_ref[...], x_ref[...], preferred_element_type=jnp.float32)
    acc = acc + b_ref[...]
    o_ref[...] = _leaky(acc).astype(o_ref.dtype)


def pointwise_conv_leaky(x_cm, w, b):
    """x_cm: (Cin, M) with M = N*H*W; w: (Cout, Cin); b: (Cout,). Returns (Cout, M)."""
    cin, m = x_cm.shape
    cout = w.shape[0]
    tm = _pick_tile(m)
    return pl.pallas_call(
        _pw_kernel,
        out_shape=jax.ShapeDtypeStruct((cout, m), x_cm.dtype),
        grid=(m // tm,),
        in_specs=[
            pl.BlockSpec((cin, tm), lambda t: (0, t)),
            pl.BlockSpec((cout, cin), lambda t: (0, 0)),
            pl.BlockSpec((cout, 1), lambda t: (0, 0)),
        ],
        out_specs=pl.BlockSpec((cout, tm), lambda t: (0, t)),
        compiler_params=pltpu.CompilerParams(
            dimension_semantics=("parallel",),
            vmem_limit_bytes=VMEM_LIMIT,
        ),
    )(x_cm, w, b.reshape(cout, 1))


# ---------------------------------------------------------------------------
# Kernel 2: fused nearest-2x-upsample(y1) ++ channel-concat ++ 1x1 conv ++ leaky.
# The concat is realized by splitting the conv weight; the upsample is realized
# by the index_map of y1 ignoring the phase grid axis (zero data movement).
# ---------------------------------------------------------------------------
def _up_concat_pw_kernel(y1_ref, y2_ref, wa_ref, wb_ref, b_ref, o_ref):
    acc = jnp.dot(wa_ref[...], y1_ref[...], preferred_element_type=jnp.float32)
    acc = acc + jnp.dot(wb_ref[...], y2_ref[...], preferred_element_type=jnp.float32)
    acc = acc + b_ref[...]
    o_ref[...] = _leaky(acc).astype(o_ref.dtype)


def upsample_concat_pointwise_leaky(y1, y2_pf, w, b):
    """y1: (C2, M_low) natural order; y2_pf: (C2, 4*M_low) phase-major order.

    w: (Cout, 2*C2) is the 1x1 weight of the DBL layer consuming cat([up(y1), y2]).
    Returns (Cout, 4*M_low) in the same phase-major order.
    """
    c2, m_low = y1.shape
    cout = w.shape[0]
    wa = w[:, :c2]          # multiplies the upsampled-x1 half of the concat
    wb = w[:, c2:]          # multiplies the x2 half of the concat
    tm = _pick_tile(m_low)
    ntiles = m_low // tm
    return pl.pallas_call(
        _up_concat_pw_kernel,
        out_shape=jax.ShapeDtypeStruct((cout, 4 * m_low), y1.dtype),
        grid=(ntiles, 4),   # phase axis innermost -> the y1 tile stays resident across phases
        in_specs=[
            pl.BlockSpec((c2, tm), lambda t, p: (0, t)),               # upsample for free
            pl.BlockSpec((c2, tm), lambda t, p: (0, p * ntiles + t)),
            pl.BlockSpec((cout, c2), lambda t, p: (0, 0)),
            pl.BlockSpec((cout, c2), lambda t, p: (0, 0)),
            pl.BlockSpec((cout, 1), lambda t, p: (0, 0)),
        ],
        out_specs=pl.BlockSpec((cout, tm), lambda t, p: (0, p * ntiles + t)),
        compiler_params=pltpu.CompilerParams(
            dimension_semantics=("parallel", "parallel"),
            vmem_limit_bytes=VMEM_LIMIT,
        ),
    )(y1, y2_pf, wa, wb, b.reshape(cout, 1))


# ---------------------------------------------------------------------------
# Kernel 3: 3x3 stride-1 "same" conv (+ folded BN bias) + leaky.
# One output row per grid step; the three padded input rows it needs are three
# row-shaped BlockSpecs of the same array (all indices static inside the kernel).
# ---------------------------------------------------------------------------
def _conv3x3_kernel(r0_ref, r1_ref, r2_ref, w_ref, b_ref, o_ref):
    cout, wout = o_ref.shape
    acc = jnp.zeros((cout, wout), jnp.float32)
    rows = (r0_ref[...], r1_ref[...], r2_ref[...])
    for dy in range(3):
        row = rows[dy]                                 # (Cin, W + 2)
        for dx in range(3):
            xs = row[:, dx:dx + wout]                  # (Cin, W)
            acc = acc + jnp.dot(w_ref[dy, dx], xs,
                                preferred_element_type=jnp.float32)
    acc = acc + b_ref[...]
    o_ref[...] = _leaky(acc).astype(o_ref.dtype)


def conv3x3_leaky(x_nchw, w_oihw, b):
    n, cin, hgt, wid = x_nchw.shape
    cout = w_oihw.shape[0]
    # Wrapper-side layout plumbing: zero-pad spatially and move H in front of C so each
    # per-step block is a clean (Cin, W+2) slab whose last two dims equal the array dims.
    xp = jnp.pad(x_nchw, ((0, 0), (0, 0), (1, 1), (1, 1)))
    xpt = jnp.transpose(xp, (0, 2, 1, 3))              # (N, H+2, Cin, W+2)
    wk = jnp.transpose(w_oihw, (2, 3, 0, 1))           # (3, 3, Cout, Cin)
    wp = wid + 2

    out = pl.pallas_call(
        _conv3x3_kernel,
        out_shape=jax.ShapeDtypeStruct((n, hgt, cout, wid), x_nchw.dtype),
        grid=(n, hgt),
        in_specs=[
            pl.BlockSpec((None, None, cin, wp), lambda nn, hh: (nn, hh, 0, 0)),
            pl.BlockSpec((None, None, cin, wp), lambda nn, hh: (nn, hh + 1, 0, 0)),
            pl.BlockSpec((None, None, cin, wp), lambda nn, hh: (nn, hh + 2, 0, 0)),
            pl.BlockSpec((3, 3, cout, cin), lambda nn, hh: (0, 0, 0, 0)),
            pl.BlockSpec((cout, 1), lambda nn, hh: (0, 0)),
        ],
        out_specs=pl.BlockSpec((None, None, cout, wid), lambda nn, hh: (nn, hh, 0, 0)),
        compiler_params=pltpu.CompilerParams(
            dimension_semantics=("parallel", "parallel"),
            vmem_limit_bytes=VMEM_LIMIT,
        ),
    )(xpt, xpt, xpt, wk, b.reshape(cout, 1))
    # TODO(synk): one output row per grid step is fine at these sizes; for large H*W, block
    # several rows per step to amortize the ~0.35us grid-step overhead.
    return jnp.transpose(out, (0, 2, 1, 3))            # (N, Cout, H, W)


# ---------------------------------------------------------------------------
# UpSampleModule forward (sam=False).  Params are inference-mode conv weights with
# BatchNorm already folded in (conv + BN == affine conv at inference).
# ---------------------------------------------------------------------------
def upsample_module_forward(x1, x2, params):
    n, c, h, w = x1.shape
    c2 = c // 2
    m_low = n * h * w

    def w2d(wt):                                       # (Cout, Cin, 1, 1) -> (Cout, Cin)
        return wt.reshape(wt.shape[0], wt.shape[1])

    # conv1x1_1 on x1: lane-dense (C, N*h*w), natural (n, h, w) column order.
    x1f = jnp.transpose(x1, (1, 0, 2, 3)).reshape(c, m_low)
    w1, b1 = params["conv1x1_1"]
    y1 = pointwise_conv_leaky(x1f, w2d(w1), b1)                        # (C/2, M_low)

    # conv1x1_2 on x2: phase-major (a, b, n, h, w) column order so up2x(y1) aligns trivially.
    x2p = x2.reshape(n, c, h, 2, w, 2)                                 # [n, c, hi, a, wi, b]
    x2pf = jnp.transpose(x2p, (1, 3, 5, 0, 2, 4)).reshape(c, 4 * m_low)
    w2, b2 = params["conv1x1_2"]
    y2 = pointwise_conv_leaky(x2pf, w2d(w2), b2)                       # (C/2, 4*M_low)

    # fused: upsample(y1) ++ cat(channel) ++ DBL1 (1x1, C -> C/2) + leaky.
    wd1, bd1 = params["dbl1"]
    d1_pf = upsample_concat_pointwise_leaky(y1, y2, w2d(wd1), bd1)     # (C/2, 4*M_low)

    # phase-major -> natural NCHW for the spatial (3x3) layers.
    d1 = (d1_pf.reshape(c2, 2, 2, n, h, w)
          .transpose(3, 0, 4, 1, 5, 2)
          .reshape(n, c2, 2 * h, 2 * w))

    wd2, bd2 = params["dbl2"]
    d2 = conv3x3_leaky(d1, wd2, bd2)                                   # (N, C, H, W)

    wd3, bd3 = params["dbl3"]
    d2f = jnp.transpose(d2, (1, 0, 2, 3)).reshape(c, 4 * m_low)
    d3f = pointwise_conv_leaky(d2f, w2d(wd3), bd3)
    d3 = jnp.transpose(d3f.reshape(c2, n, 2 * h, 2 * w), (1, 0, 2, 3))

    wd4, bd4 = params["dbl4"]
    d4 = conv3x3_leaky(d3, wd4, bd4)                                   # (N, C, H, W)

    wd5, bd5 = params["dbl5"]
    d4f = jnp.transpose(d4, (1, 0, 2, 3)).reshape(c, 4 * m_low)
    d5f = pointwise_conv_leaky(d4f, w2d(wd5), bd5)
    return jnp.transpose(d5f.reshape(c2, n, 2 * h, 2 * w), (1, 0, 2, 3))
    # TODO(synk): sam=True branch (YOLO_SAM_Module before the last DBL) not implemented;
    # this is the default sam=False path.


# ---------------------------------------------------------------------------
# Pure-JAX reference (same folded-BN params) for verification.
# ---------------------------------------------------------------------------
def _ref_conv_bn_leaky(x, w, b, pad):
    y = lax.conv_general_dilated(
        x, w, window_strides=(1, 1), padding=((pad, pad), (pad, pad)),
        dimension_numbers=("NCHW", "OIHW", "NCHW"),
        precision=lax.Precision.HIGHEST)
    return _leaky(y + b.reshape(1, -1, 1, 1))


def reference_forward(x1, x2, params):
    y1 = _ref_conv_bn_leaky(x1, *params["conv1x1_1"], 0)
    y2 = _ref_conv_bn_leaky(x2, *params["conv1x1_2"], 0)
    u = jnp.repeat(jnp.repeat(y1, 2, axis=2), 2, axis=3)   # F.interpolate nearest, x2
    out = jnp.concatenate([u, y2], axis=1)                 # torch.cat(..., dim=1)
    out = _ref_conv_bn_leaky(out, *params["dbl1"], 0)
    out = _ref_conv_bn_leaky(out, *params["dbl2"], 1)
    out = _ref_conv_bn_leaky(out, *params["dbl3"], 0)
    out = _ref_conv_bn_leaky(out, *params["dbl4"], 1)
    out = _ref_conv_bn_leaky(out, *params["dbl5"], 0)
    return out


def _init_conv(key, cout, cin, k):
    # TODO(synk): training-mode BatchNorm (running-stat updates) is out of scope; BN is
    # folded into the effective (w, b) of each conv (inference semantics).
    kw, kb = jax.random.split(key)
    w = jax.random.normal(kw, (cout, cin, k, k), jnp.float32) * ((cin * k * k) ** -0.5)
    b = 0.1 * jax.random.normal(kb, (cout,), jnp.float32)
    return w, b


if __name__ == "__main__":
    key = jax.random.PRNGKey(0)
    keys = jax.random.split(key, 9)

    N, C = 2, 32                    # in_channels = 32 -> module output channels = 16
    h, w = 8, 8                     # x1 is low-res; x2 is (2h, 2w) = (16, 16)
    x1 = jax.random.normal(keys[0], (N, C, h, w), jnp.float32)
    x2 = jax.random.normal(keys[1], (N, C, 2 * h, 2 * w), jnp.float32)

    C2 = C // 2
    params = {
        "conv1x1_1": _init_conv(keys[2], C2, C, 1),
        "conv1x1_2": _init_conv(keys[3], C2, C, 1),
        "dbl1": _init_conv(keys[4], C2, C, 1),
        "dbl2": _init_conv(keys[5], C, C2, 3),
        "dbl3": _init_conv(keys[6], C2, C, 1),
        "dbl4": _init_conv(keys[7], C, C2, 3),
        "dbl5": _init_conv(keys[8], C2, C, 1),
    }

    fwd = jax.jit(upsample_module_forward)
    out = jax.block_until_ready(fwd(x1, x2, params))

    ref = reference_forward(x1, x2, params)
    assert out.shape == (N, C2, 2 * h, 2 * w), out.shape
    assert jnp.allclose(out, ref, rtol=2e-2, atol=2e-2), float(jnp.max(jnp.abs(out - ref)))

    print("KERNEL_OK")
</pallas_src>

<mosaic_0001>
module attributes {stable_mosaic.version = 11 : i64} {
  func.func @_pw_kernel(%arg0: i32, %arg1: memref<32x512xf32, #tpu.memory_space<vmem>>, %arg2: memref<16x32xf32, #tpu.memory_space<vmem>>, %arg3: memref<16x1xf32, #tpu.memory_space<vmem>>, %arg4: memref<16x512xf32, #tpu.memory_space<vmem>>) attributes {dimension_semantics = [#tpu.dimension_semantics<parallel>], iteration_bounds = array<i64: 1>, scalar_prefetch = 0 : i64, scratch_operands = 0 : i64, tpu.core_type = #tpu.core_type<tc>, window_params = [{transform_indices = @transform_0, window_bounds = array<i64: 32, 512>}, {pipeline_mode = #tpu.pipeline_mode<synchronous>, transform_indices = @transform_1, window_bounds = array<i64: 16, 32>}, {pipeline_mode = #tpu.pipeline_mode<synchronous>, transform_indices = @transform_2, window_bounds = array<i64: 16, 1>}, {transform_indices = @transform_3, window_bounds = array<i64: 16, 512>}]} {
    %c0 = arith.constant 0 : index
    %c0_0 = arith.constant 0 : index
    %0 = vector.load %arg2[%c0, %c0_0] : memref<16x32xf32, #tpu.memory_space<vmem>>, vector<16x32xf32>
    %c0_1 = arith.constant 0 : index
    %c0_2 = arith.constant 0 : index
    %1 = vector.load %arg1[%c0_1, %c0_2] : memref<32x512xf32, #tpu.memory_space<vmem>>, vector<32x512xf32>
    %cst = arith.constant dense<0.000000e+00> : vector<16x512xf32>
    %2 = tpu.matmul %0, %1, %cst {dimension_numbers = #tpu.dot_dimension_numbers<[1], [0], [0], [1], [0, 0, 1, 1], [], []>} : vector<16x32xf32>, vector<32x512xf32>, vector<16x512xf32> -> vector<16x512xf32>
    %c0_3 = arith.constant 0 : index
    %c0_4 = arith.constant 0 : index
    %3 = vector.load %arg3[%c0_3, %c0_4] : memref<16x1xf32, #tpu.memory_space<vmem>>, vector<16x1xf32>
    %4 = vector.broadcast %3 : vector<16x1xf32> to vector<16x512xf32>
    %5 = arith.addf %2, %4 : vector<16x512xf32>
    %cst_5 = arith.constant 0.000000e+00 : f32
    %6 = vector.broadcast %cst_5 : f32 to vector<16x512xf32>
    %7 = arith.cmpf oge, %5, %6 : vector<16x512xf32>
    %cst_6 = arith.constant 1.000000e-01 : f32
    %8 = vector.broadcast %cst_6 : f32 to vector<16x512xf32>
    %9 = arith.mulf %8, %5 : vector<16x512xf32>
    %10 = arith.select %7, %5, %9 : vector<16x512xi1>, vector<16x512xf32>
    %c0_7 = arith.constant 0 : index
    %c0_8 = arith.constant 0 : index
    %11 = vector.load %arg4[%c0_7, %c0_8] : memref<16x512xf32, #tpu.memory_space<vmem>>, vector<16x512xf32>
    tpu.vector_store %arg4[%c0_7, %c0_8], %10 {strides = array<i32>} : memref<16x512xf32, #tpu.memory_space<vmem>>, vector<16x512xf32>,
    return
  }
  func.func @transform_0(%arg0: i32) -> (i32, i32) {
    %c0_i32 = arith.constant 0 : i32
    %c0_i32_0 = arith.constant 0 : i32
    return %c0_i32, %arg0 : i32, i32
  }
  func.func @transform_1(%arg0: i32) -> (i32, i32) {
    %c0_i32 = arith.constant 0 : i32
    %c0_i32_0 = arith.constant 0 : i32
    %c0_i32_1 = arith.constant 0 : i32
    return %c0_i32, %c0_i32_0 : i32, i32
  }
  func.func @transform_2(%arg0: i32) -> (i32, i32) {
    %c0_i32 = arith.constant 0 : i32
    %c0_i32_0 = arith.constant 0 : i32
    %c0_i32_1 = arith.constant 0 : i32
    return %c0_i32, %c0_i32_0 : i32, i32
  }
  func.func @transform_3(%arg0: i32) -> (i32, i32) {
    %c0_i32 = arith.constant 0 : i32
    %c0_i32_0 = arith.constant 0 : i32
    return %c0_i32, %arg0 : i32, i32
  }
}

module attributes {stable_mosaic.version = 11 : i64} {
  func.func @_pw_kernel(%arg0: i32, %arg1: memref<32x128xf32, #tpu.memory_space<vmem>>, %arg2: memref<16x32xf32, #tpu.memory_space<vmem>>, %arg3: memref<16x1xf32, #tpu.memory_space<vmem>>, %arg4: memref<16x128xf32, #tpu.memory_space<vmem>>) attributes {dimension_semantics = [#tpu.dimension_semantics<parallel>], iteration_bounds = array<i64: 1>, scalar_prefetch = 0 : i64, scratch_operands = 0 : i64, tpu.core_type = #tpu.core_type<tc>, window_params = [{transform_indices = @transform_0, window_bounds = array<i64: 32, 128>}, {pipeline_mode = #tpu.pipeline_mode<synchronous>, transform_indices = @transform_1, window_bounds = array<i64: 16, 32>}, {pipeline_mode = #tpu.pipeline_mode<synchronous>, transform_indices = @transform_2, window_bounds = array<i64: 16, 1>}, {transform_indices = @transform_3, window_bounds = array<i64: 16, 128>}]} {
    %c0 = arith.constant 0 : index
    %c0_0 = arith.constant 0 : index
    %0 = vector.load %arg2[%c0, %c0_0] : memref<16x32xf32, #tpu.memory_space<vmem>>, vector<16x32xf32>
    %c0_1 = arith.constant 0 : index
    %c0_2 = arith.constant 0 : index
    %1 = vector.load %arg1[%c0_1, %c0_2] : memref<32x128xf32, #tpu.memory_space<vmem>>, vector<32x128xf32>
    %cst = arith.constant dense<0.000000e+00> : vector<16x128xf32>
    %2 = tpu.matmul %0, %1, %cst {dimension_numbers = #tpu.dot_dimension_numbers<[1], [0], [0], [1], [0, 0, 1, 1], [], []>} : vector<16x32xf32>, vector<32x128xf32>, vector<16x128xf32> -> vector<16x128xf32>
    %c0_3 = arith.constant 0 : index
    %c0_4 = arith.constant 0 : index
    %3 = vector.load %arg3[%c0_3, %c0_4] : memref<16x1xf32, #tpu.memory_space<vmem>>, vector<16x1xf32>
    %4 = vector.broadcast %3 : vector<16x1xf32> to vector<16x128xf32>
    %5 = arith.addf %2, %4 : vector<16x128xf32>
    %cst_5 = arith.constant 0.000000e+00 : f32
    %6 = vector.broadcast %cst_5 : f32 to vector<16x128xf32>
    %7 = arith.cmpf oge, %5, %6 : vector<16x128xf32>
    %cst_6 = arith.constant 1.000000e-01 : f32
    %8 = vector.broadcast %cst_6 : f32 to vector<16x128xf32>
    %9 = arith.mulf %8, %5 : vector<16x128xf32>
    %10 = arith.select %7, %5, %9 : vector<16x128xi1>, vector<16x128xf32>
    %c0_7 = arith.constant 0 : index
    %c0_8 = arith.constant 0 : index
    %11 = vector.load %arg4[%c0_7, %c0_8] : memref<16x128xf32, #tpu.memory_space<vmem>>, vector<16x128xf32>
    tpu.vector_store %arg4[%c0_7, %c0_8], %10 {strides = array<i32>} : memref<16x128xf32, #tpu.memory_space<vmem>>, vector<16x128xf32>,
    return
  }
  func.func @transform_0(%arg0: i32) -> (i32, i32) {
    %c0_i32 = arith.constant 0 : i32
    %c0_i32_0 = arith.constant 0 : i32
    return %c0_i32, %arg0 : i32, i32
  }
  func.func @transform_1(%arg0: i32) -> (i32, i32) {
    %c0_i32 = arith.constant 0 : i32
    %c0_i32_0 = arith.constant 0 : i32
    %c0_i32_1 = arith.constant 0 : i32
    return %c0_i32, %c0_i32_0 : i32, i32
  }
  func.func @transform_2(%arg0: i32) -> (i32, i32) {
    %c0_i32 = arith.constant 0 : i32
    %c0_i32_0 = arith.constant 0 : i32
    %c0_i32_1 = arith.constant 0 : i32
    return %c0_i32, %c0_i32_0 : i32, i32
  }
  func.func @transform_3(%arg0: i32) -> (i32, i32) {
    %c0_i32 = arith.constant 0 : i32
    %c0_i32_0 = arith.constant 0 : i32
    return %c0_i32, %arg0 : i32, i32
  }
}

module attributes {stable_mosaic.version = 11 : i64} {
  func.func @_up_concat_pw_kernel(%arg0: i32, %arg1: i32, %arg2: memref<16x128xf32, #tpu.memory_space<vmem>>, %arg3: memref<16x128xf32, #tpu.memory_space<vmem>>, %arg4: memref<16x16xf32, #tpu.memory_space<vmem>>, %arg5: memref<16x16xf32, #tpu.memory_space<vmem>>, %arg6: memref<16x1xf32, #tpu.memory_space<vmem>>, %arg7: memref<16x128xf32, #tpu.memory_space<vmem>>) attributes {dimension_semantics = [#tpu.dimension_semantics<parallel>, #tpu.dimension_semantics<parallel>], iteration_bounds = array<i64: 1, 4>, scalar_prefetch = 0 : i64, scratch_operands = 0 : i64, tpu.core_type = #tpu.core_type<tc>, window_params = [{transform_indices = @transform_0, window_bounds = array<i64: 16, 128>}, {transform_indices = @transform_1, window_bounds = array<i64: 16, 128>}, {pipeline_mode = #tpu.pipeline_mode<synchronous>, transform_indices = @transform_2, window_bounds = array<i64: 16, 16>}, {pipeline_mode = #tpu.pipeline_mode<synchronous>, transform_indices = @transform_3, window_bounds = array<i64: 16, 16>}, {pipeline_mode = #tpu.pipeline_mode<synchronous>, transform_indices = @transform_4, window_bounds = array<i64: 16, 1>}, {transform_indices = @transform_5, window_bounds = array<i64: 16, 128>}]} {
    %c0 = arith.constant 0 : index
    %c0_0 = arith.constant 0 : index
    %0 = vector.load %arg4[%c0, %c0_0] : memref<16x16xf32, #tpu.memory_space<vmem>>, vector<16x16xf32>
    %c0_1 = arith.constant 0 : index
    %c0_2 = arith.constant 0 : index
    %1 = vector.load %arg2[%c0_1, %c0_2] : memref<16x128xf32, #tpu.memory_space<vmem>>, vector<16x128xf32>
    %cst = arith.constant dense<0.000000e+00> : vector<16x128xf32>
    %2 = tpu.matmul %0, %1, %cst {dimension_numbers = #tpu.dot_dimension_numbers<[1], [0], [0], [1], [0, 0, 1, 1], [], []>} : vector<16x16xf32>, vector<16x128xf32>, vector<16x128xf32> -> vector<16x128xf32>
    %c0_3 = arith.constant 0 : index
    %c0_4 = arith.constant 0 : index
    %3 = vector.load %arg5[%c0_3, %c0_4] : memref<16x16xf32, #tpu.memory_space<vmem>>, vector<16x16xf32>
    %c0_5 = arith.constant 0 : index
    %c0_6 = arith.constant 0 : index
    %4 = vector.load %arg3[%c0_5, %c0_6] : memref<16x128xf32, #tpu.memory_space<vmem>>, vector<16x128xf32>
    %cst_7 = arith.constant dense<0.000000e+00> : vector<16x128xf32>
    %5 = tpu.matmul %3, %4, %cst_7 {dimension_numbers = #tpu.dot_dimension_numbers<[1], [0], [0], [1], [0, 0, 1, 1], [], []>} : vector<16x16xf32>, vector<16x128xf32>, vector<16x128xf32> -> vector<16x128xf32>
    %6 = arith.addf %2, %5 : vector<16x128xf32>
    %c0_8 = arith.constant 0 : index
    %c0_9 = arith.constant 0 : index
    %7 = vector.load %arg6[%c0_8, %c0_9] : memref<16x1xf32, #tpu.memory_space<vmem>>, vector<16x1xf32>
    %8 = vector.broadcast %7 : vector<16x1xf32> to vector<16x128xf32>
    %9 = arith.addf %6, %8 : vector<16x128xf32>
    %cst_10 = arith.constant 0.000000e+00 : f32
    %10 = vector.broadcast %cst_10 : f32 to vector<16x128xf32>
    %11 = arith.cmpf oge, %9, %10 : vector<16x128xf32>
    %cst_11 = arith.constant 1.000000e-01 : f32
    %12 = vector.broadcast %cst_11 : f32 to vector<16x128xf32>
    %13 = arith.mulf %12, %9 : vector<16x128xf32>
    %14 = arith.select %11, %9, %13 : vector<16x128xi1>, vector<16x128xf32>
    %c0_12 = arith.constant 0 : index
    %c0_13 = arith.constant 0 : index
    %15 = vector.load %arg7[%c0_12, %c0_13] : memref<16x128xf32, #tpu.memory_space<vmem>>, vector<16x128xf32>
    tpu.vector_store %arg7[%c0_12, %c0_13], %14 {strides = array<i32>} : memref<16x128xf32, #tpu.memory_space<vmem>>, vector<16x128xf32>,
    return
  }
  func.func @transform_0(%arg0: i32, %arg1: i32) -> (i32, i32) {
    %c0_i32 = arith.constant 0 : i32
    %c0_i32_0 = arith.constant 0 : i32
    return %c0_i32, %arg0 : i32, i32
  }
  func.func @transform_1(%arg0: i32, %arg1: i32) -> (i32, i32) {
    %c1_i32 = arith.constant 1 : i32
    %0 = arith.muli %arg1, %c1_i32 : i32
    %1 = arith.addi %0, %arg0 : i32
    %c0_i32 = arith.constant 0 : i32
    %c0_i32_0 = arith.constant 0 : i32
    return %c0_i32, %1 : i32, i32
  }
  func.func @transform_2(%arg0: i32, %arg1: i32) -> (i32, i32) {
    %c0_i32 = arith.constant 0 : i32
    %c0_i32_0 = arith.constant 0 : i32
    %c0_i32_1 = arith.constant 0 : i32
    return %c0_i32, %c0_i32_0 : i32, i32
  }
  func.func @transform_3(%arg0: i32, %arg1: i32) -> (i32, i32) {
    %c0_i32 = arith.constant 0 : i32
    %c0_i32_0 = arith.constant 0 : i32
    %c0_i32_1 = arith.constant 0 : i32
    return %c0_i32, %c0_i32_0 : i32, i32
  }
  func.func @transform_4(%arg0: i32, %arg1: i32) -> (i32, i32) {
    %c0_i32 = arith.constant 0 : i32
    %c0_i32_0 = arith.constant 0 : i32
    %c0_i32_1 = arith.constant 0 : i32
    return %c0_i32, %c0_i32_0 : i32, i32
  }
  func.func @transform_5(%arg0: i32, %arg1: i32) -> (i32, i32) {
    %c1_i32 = arith.constant 1 : i32
    %0 = arith.muli %arg1, %c1_i32 : i32
    %1 = arith.addi %0, %arg0 : i32
    %c0_i32 = arith.constant 0 : i32
    %c0_i32_0 = arith.constant 0 : i32
    return %c0_i32, %1 : i32, i32
  }
}

module attributes {stable_mosaic.version = 11 : i64} {
  func.func @_conv3x3_kernel(%arg0: i32, %arg1: i32, %arg2: memref<1x1x16x18xf32, #tpu.memory_space<vmem>>, %arg3: memref<1x1x16x18xf32, #tpu.memory_space<vmem>>, %arg4: memref<1x1x16x18xf32, #tpu.memory_space<vmem>>, %arg5: memref<3x3x32x16xf32, #tpu.memory_space<vmem>>, %arg6: memref<32x1xf32, #tpu.memory_space<vmem>>, %arg7: memref<1x1x32x16xf32, #tpu.memory_space<vmem>>) attributes {dimension_semantics = [#tpu.dimension_semantics<parallel>, #tpu.dimension_semantics<parallel>], iteration_bounds = array<i64: 2, 16>, scalar_prefetch = 0 : i64, scratch_operands = 0 : i64, tpu.core_type = #tpu.core_type<tc>, window_params = [{transform_indices = @transform_0, window_bounds = array<i64: 1, 1, 16, 18>}, {transform_indices = @transform_1, window_bounds = array<i64: 1, 1, 16, 18>}, {transform_indices = @transform_2, window_bounds = array<i64: 1, 1, 16, 18>}, {pipeline_mode = #tpu.pipeline_mode<synchronous>, transform_indices = @transform_3, window_bounds = array<i64: 3, 3, 32, 16>}, {pipeline_mode = #tpu.pipeline_mode<synchronous>, transform_indices = @transform_4, window_bounds = array<i64: 32, 1>}, {transform_indices = @transform_5, window_bounds = array<i64: 1, 1, 32, 16>}]} {
    %cst = arith.constant 0.000000e+00 : f32
    %0 = vector.broadcast %cst : f32 to vector<32x16xf32>
    %c0 = arith.constant 0 : index
    %c0_0 = arith.constant 0 : index
    %c0_1 = arith.constant 0 : index
    %c0_2 = arith.constant 0 : index
    %1 = vector.load %arg2[%c0, %c0_0, %c0_1, %c0_2] : memref<1x1x16x18xf32, #tpu.memory_space<vmem>>, vector<1x1x16x18xf32>
    %2 = vector.shape_cast %1 : vector<1x1x16x18xf32> to vector<16x18xf32>
    %c0_3 = arith.constant 0 : index
    %c0_4 = arith.constant 0 : index
    %c0_5 = arith.constant 0 : index
    %c0_6 = arith.constant 0 : index
    %3 = vector.load %arg3[%c0_3, %c0_4, %c0_5, %c0_6] : memref<1x1x16x18xf32, #tpu.memory_space<vmem>>, vector<1x1x16x18xf32>
    %4 = vector.shape_cast %3 : vector<1x1x16x18xf32> to vector<16x18xf32>
    %c0_7 = arith.constant 0 : index
    %c0_8 = arith.constant 0 : index
    %c0_9 = arith.constant 0 : index
    %c0_10 = arith.constant 0 : index
    %5 = vector.load %arg4[%c0_7, %c0_8, %c0_9, %c0_10] : memref<1x1x16x18xf32, #tpu.memory_space<vmem>>, vector<1x1x16x18xf32>
    %6 = vector.shape_cast %5 : vector<1x1x16x18xf32> to vector<16x18xf32>
    %7 = vector.extract_strided_slice %2 {offsets = [0, 0], sizes = [16, 16], strides = [1, 1]} : vector<16x18xf32> to vector<16x16xf32>
    %c0_11 = arith.constant 0 : index
    %c0_12 = arith.constant 0 : index
    %c0_13 = arith.constant 0 : index
    %c0_14 = arith.constant 0 : index
    %8 = vector.load %arg5[%c0_11, %c0_12, %c0_13, %c0_14] : memref<3x3x32x16xf32, #tpu.memory_space<vmem>>, vector<1x1x32x16xf32>
    %9 = vector.shape_cast %8 : vector<1x1x32x16xf32> to vector<32x16xf32>
    %cst_15 = arith.constant dense<0.000000e+00> : vector<32x16xf32>
    %10 = tpu.matmul %9, %7, %cst_15 {dimension_numbers = #tpu.dot_dimension_numbers<[1], [0], [0], [1], [0, 0, 1, 1], [], []>} : vector<32x16xf32>, vector<16x16xf32>, vector<32x16xf32> -> vector<32x16xf32>
    %11 = arith.addf %0, %10 : vector<32x16xf32>
    %12 = vector.extract_strided_slice %2 {offsets = [0, 1], sizes = [16, 16], strides = [1, 1]} : vector<16x18xf32> to vector<16x16xf32>
    %c0_16 = arith.constant 0 : index
    %c1 = arith.constant 1 : index
    %c0_17 = arith.constant 0 : index
    %c0_18 = arith.constant 0 : index
    %13 = vector.load %arg5[%c0_16, %c1, %c0_17, %c0_18] : memref<3x3x32x16xf32, #tpu.memory_space<vmem>>, vector<1x1x32x16xf32>
    %14 = vector.shape_cast %13 : vector<1x1x32x16xf32> to vector<32x16xf32>
    %cst_19 = arith.constant dense<0.000000e+00> : vector<32x16xf32>
    %15 = tpu.matmul %14, %12, %cst_19 {dimension_numbers = #tpu.dot_dimension_numbers<[1], [0], [0], [1], [0, 0, 1, 1], [], []>} : vector<32x16xf32>, vector<16x16xf32>, vector<32x16xf32> -> vector<32x16xf32>
    %16 = arith.addf %11, %15 : vector<32x16xf32>
    %17 = vector.extract_strided_slice %2 {offsets = [0, 2], sizes = [16, 16], strides = [1, 1]} : vector<16x18xf32> to vector<16x16xf32>
    %c0_20 = arith.constant 0 : index
    %c2 = arith.constant 2 : index
    %c0_21 = arith.constant 0 : index
    %c0_22 = arith.constant 0 : index
    %18 = vector.load %arg5[%c0_20, %c2, %c0_21, %c0_22] : memref<3x3x32x16xf32, #tpu.memory_space<vmem>>, vector<1x1x32x16xf32>
    %19 = vector.shape_cast %18 : vector<1x1x32x16xf32> to vector<32x16xf32>
    %cst_23 = arith.constant dense<0.000000e+00> : vector<32x16xf32>
    %20 = tpu.matmul %19, %17, %cst_23 {dimension_numbers = #tpu.dot_dimension_numbers<[1], [0], [0], [1], [0, 0, 1, 1], [], []>} : vector<32x16xf32>, vector<16x16xf32>, vector<32x16xf32> -> vector<32x16xf32>
    %21 = arith.addf %16, %20 : vector<32x16xf32>
    %22 = vector.extract_strided_slice %4 {offsets = [0, 0], sizes = [16, 16], strides = [1, 1]} : vector<16x18xf32> to vector<16x16xf32>
    %c1_24 = arith.constant 1 : index
    %c0_25 = arith.constant 0 : index
    %c0_26 = arith.constant 0 : index
    %c0_27 = arith.constant 0 : index
    %23 = vector.load %arg5[%c1_24, %c0_25, %c0_26, %c0_27] : memref<3x3x32x16xf32, #tpu.memory_space<vmem>>, vector<1x1x32x16xf32>
    %24 = vector.shape_cast %23 : vector<1x1x32x16xf32> to vector<32x16xf32>
    %cst_28 = arith.constant dense<0.000000e+00> : vector<32x16xf32>
    %25 = tpu.matmul %24, %22, %cst_28 {dimension_numbers = #tpu.dot_dimension_numbers<[1], [0], [0], [1], [0, 0, 1, 1], [], []>} : vector<32x16xf32>, vector<16x16xf32>, vector<32x16xf32> -> vector<32x16xf32>
    %26 = arith.addf %21, %25 : vector<32x16xf32>
    %27 = vector.extract_strided_slice %4 {offsets = [0, 1], sizes = [16, 16], strides = [1, 1]} : vector<16x18xf32> to vector<16x16xf32>
    %c1_29 = arith.constant 1 : index
    %c1_30 = arith.constant 1 : index
    %c0_31 = arith.constant 0 : index
    %c0_32 = arith.constant 0 : index
    %28 = vector.load %arg5[%c1_29, %c1_30, %c0_31, %c0_32] : memref<3x3x32x16xf32, #tpu.memory_space<vmem>>, vector<1x1x32x16xf32>
    %29 = vector.shape_cast %28 : vector<1x1x32x16xf32> to vector<32x16xf32>
    %cst_33 = arith.constant dense<0.000000e+00> : vector<32x16xf32>
    %30 = tpu.matmul %29, %27, %cst_33 {dimension_numbers = #tpu.dot_dimension_numbers<[1], [0], [0], [1], [0, 0, 1, 1], [], []>} : vector<32x16xf32>, vector<16x16xf32>, vector<32x16xf32> -> vector<32x16xf32>
    %31 = arith.addf %26, %30 : vector<32x16xf32>
    %32 = vector.extract_strided_slice %4 {offsets = [0, 2], sizes = [16, 16], strides = [1, 1]} : vector<16x18xf32> to vector<16x16xf32>
    %c1_34 = arith.constant 1 : index
    %c2_35 = arith.constant 2 : index
    %c0_36 = arith.constant 0 : index
    %c0_37 = arith.constant 0 : index
    %33 = vector.load %arg5[%c1_34, %c2_35, %c0_36, %c0_37] : memref<3x3x32x16xf32, #tpu.memory_space<vmem>>, vector<1x1x32x16xf32>
    %34 = vector.shape_cast %33 : vector<1x1x32x16xf32> to vector<32x16xf32>
    %cst_38 = arith.constant dense<0.000000e+00> : vector<32x16xf32>
    %35 = tpu.matmul %34, %32, %cst_38 {dimension_numbers = #tpu.dot_dimension_numbers<[1], [0], [0], [1], [0, 0, 1, 1], [], []>} : vector<32x16xf32>, vector<16x16xf32>, vector<32x16xf32> -> vector<32x16xf32>
    %36 = arith.addf %31, %35 : vector<32x16xf32>
    %37 = vector.extract_strided_slice %6 {offsets = [0, 0], sizes = [16, 16], strides = [1, 1]} : vector<16x18xf32> to vector<16x16xf32>
    %c2_39 = arith.constant 2 : index
    %c0_40 = arith.constant 0 : index
    %c0_41 = arith.constant 0 : index
    %c0_42 = arith.constant 0 : index
    %38 = vector.load %arg5[%c2_39, %c0_40, %c0_41, %c0_42] : memref<3x3x32x16xf32, #tpu.memory_space<vmem>>, vector<1x1x32x16xf32>
    %39 = vector.shape_cast %38 : vector<1x1x32x16xf32> to vector<32x16xf32>
    %cst_43 = arith.constant dense<0.000000e+00> : vector<32x16xf32>
    %40 = tpu.matmul %39, %37, %cst_43 {dimension_numbers = #tpu.dot_dimension_numbers<[1], [0], [0], [1], [0, 0, 1, 1], [], []>} : vector<32x16xf32>, vector<16x16xf32>, vector<32x16xf32> -> vector<32x16xf32>
    %41 = arith.addf %36, %40 : vector<32x16xf32>
    %42 = vector.extract_strided_slice %6 {offsets = [0, 1], sizes = [16, 16], strides = [1, 1]} : vector<16x18xf32> to vector<16x16xf32>
    %c2_44 = arith.constant 2 : index
    %c1_45 = arith.constant 1 : index
    %c0_46 = arith.constant 0 : index
    %c0_47 = arith.constant 0 : index
    %43 = vector.load %arg5[%c2_44, %c1_45, %c0_46, %c0_47] : memref<3x3x32x16xf32, #tpu.memory_space<vmem>>, vector<1x1x32x16xf32>
    %44 = vector.shape_cast %43 : vector<1x1x32x16xf32> to vector<32x16xf32>
    %cst_48 = arith.constant dense<0.000000e+00> : vector<32x16xf32>
    %45 = tpu.matmul %44, %42, %cst_48 {dimension_numbers = #tpu.dot_dimension_numbers<[1], [0], [0], [1], [0, 0, 1, 1], [], []>} : vector<32x16xf32>, vector<16x16xf32>, vector<32x16xf32> -> vector<32x16xf32>
    %46 = arith.addf %41, %45 : vector<32x16xf32>
    %47 = vector.extract_strided_slice %6 {offsets = [0, 2], sizes = [16, 16], strides = [1, 1]} : vector<16x18xf32> to vector<16x16xf32>
    %c2_49 = arith.constant 2 : index
    %c2_50 = arith.constant 2 : index
    %c0_51 = arith.constant 0 : index
    %c0_52 = arith.constant 0 : index
    %48 = vector.load %arg5[%c2_49, %c2_50, %c0_51, %c0_52] : memref<3x3x32x16xf32, #tpu.memory_space<vmem>>, vector<1x1x32x16xf32>
    %49 = vector.shape_cast %48 : vector<1x1x32x16xf32> to vector<32x16xf32>
    %cst_53 = arith.constant dense<0.000000e+00> : vector<32x16xf32>
    %50 = tpu.matmul %49, %47, %cst_53 {dimension_numbers = #tpu.dot_dimension_numbers<[1], [0], [0], [1], [0, 0, 1, 1], [], []>} : vector<32x16xf32>, vector<16x16xf32>, vector<32x16xf32> -> vector<32x16xf32>
    %51 = arith.addf %46, %50 : vector<32x16xf32>
    %c0_54 = arith.constant 0 : index
    %c0_55 = arith.constant 0 : index
    %52 = vector.load %arg6[%c0_54, %c0_55] : memref<32x1xf32, #tpu.memory_space<vmem>>, vector<32x1xf32>
    %53 = vector.broadcast %52 : vector<32x1xf32> to vector<32x16xf32>
    %54 = arith.addf %51, %53 : vector<32x16xf32>
    %cst_56 = arith.constant 0.000000e+00 : f32
    %55 = vector.broadcast %cst_56 : f32 to vector<32x16xf32>
    %56 = arith.cmpf oge, %54, %55 : vector<32x16xf32>
    %cst_57 = arith.constant 1.000000e-01 : f32
    %57 = vector.broadcast %cst_57 : f32 to vector<32x16xf32>
    %58 = arith.mulf %57, %54 : vector<32x16xf32>
    %59 = arith.select %56, %54, %58 : vector<32x16xi1>, vector<32x16xf32>
    %c0_58 = arith.constant 0 : index
    %c0_59 = arith.constant 0 : index
    %c0_60 = arith.constant 0 : index
    %c0_61 = arith.constant 0 : index
    %60 = vector.load %arg7[%c0_58, %c0_59, %c0_60, %c0_61] : memref<1x1x32x16xf32, #tpu.memory_space<vmem>>, vector<1x1x32x16xf32>
    %61 = vector.shape_cast %60 : vector<1x1x32x16xf32> to vector<32x16xf32>
    %62 = vector.shape_cast %59 : vector<32x16xf32> to vector<1x1x32x16xf32>
    tpu.vector_store %arg7[%c0_58, %c0_59, %c0_60, %c0_61], %62 {strides = array<i32>} : memref<1x1x32x16xf32, #tpu.memory_space<vmem>>, vector<1x1x32x16xf32>,
    return
  }
  func.func @transform_0(%arg0: i32, %arg1: i32) -> (i32, i32, i32, i32) {
    %c0_i32 = arith.constant 0 : i32
    %c0_i32_0 = arith.constant 0 : i32
    %c0_i32_1 = arith.constant 0 : i32
    return %arg0, %arg1, %c0_i32, %c0_i32_0 : i32, i32, i32, i32
  }
  func.func @transform_1(%arg0: i32, %arg1: i32) -> (i32, i32, i32, i32) {
    %c1_i32 = arith.constant 1 : i32
    %0 = arith.addi %arg1, %c1_i32 : i32
    %c0_i32 = arith.constant 0 : i32
    %c0_i32_0 = arith.constant 0 : i32
    %c0_i32_1 = arith.constant 0 : i32
    return %arg0, %0, %c0_i32, %c0_i32_0 : i32, i32, i32, i32
  }
  func.func @transform_2(%arg0: i32, %arg1: i32) -> (i32, i32, i32, i32) {
    %c2_i32 = arith.constant 2 : i32
    %0 = arith.addi %arg1, %c2_i32 : i32
    %c0_i32 = arith.constant 0 : i32
    %c0_i32_0 = arith.constant 0 : i32
    %c0_i32_1 = arith.constant 0 : i32
    return %arg0, %0, %c0_i32, %c0_i32_0 : i32, i32, i32, i32
  }
  func.func @transform_3(%arg0: i32, %arg1: i32) -> (i32, i32, i32, i32) {
    %c0_i32 = arith.constant 0 : i32
    %c0_i32_0 = arith.constant 0 : i32
    %c0_i32_1 = arith.constant 0 : i32
    %c0_i32_2 = arith.constant 0 : i32
    %c0_i32_3 = arith.constant 0 : i32
    return %c0_i32, %c0_i32_0, %c0_i32_1, %c0_i32_2 : i32, i32, i32, i32
  }
  func.func @transform_4(%arg0: i32, %arg1: i32) -> (i32, i32) {
    %c0_i32 = arith.constant 0 : i32
    %c0_i32_0 = arith.constant 0 : i32
    %c0_i32_1 = arith.constant 0 : i32
    return %c0_i32, %c0_i32_0 : i32, i32
  }
  func.func @transform_5(%arg0: i32, %arg1: i32) -> (i32, i32, i32, i32) {
    %c0_i32 = arith.constant 0 : i32
    %c0_i32_0 = arith.constant 0 : i32
    %c0_i32_1 = arith.constant 0 : i32
    return %arg0, %arg1, %c0_i32, %c0_i32_0 : i32, i32, i32, i32
  }
}

</mosaic_0001>

<bundles_post_ra>
// kernel: upsample_module_forward.7
= control target key start
LH: loop header
LB: loop body
LE: loop exit
PB: predicated region body
PF: predicated region fallthrough
CT: control target
= control target key end

     0   :  { %vm32_vm0 = vcmask 261120   ;;  %v147_v2 = vmov 0   ;;  %s200_s0 = inlined_call_operand.vmem [shape: f32[32,128], index: 0, kind: input, shape index: {}]   ;;  %s201_s1 = inlined_call_operand.vmem [shape: f32[16,32], index: 1, kind: input, shape index: {}]   ;;  %s202_s2 = inlined_call_operand.vmem [shape: f32[16,1], index: 2, kind: input, shape index: {}]   ;;  %s203_s3 = inlined_call_operand.vmem [shape: f32[16,128], index: 3, kind: output, shape index: {}]  }
   0x1   :  { %v19_v0 = vld [vmem:[%s200_s0 + $0x18] sm:$0xff]  ;;  %v18_v1 = vld [vmem:[%s200_s0 + $0x10] sm:$0xff]  ;;  %146 = vset.pattern.permute.xlu0 %v147_v2  ;;  %v14_v3 = vld [vmem:[%s201_s1] sm:$0xff] }
   0x2   :  { %134 = vmatprep.subr.mxu0 %v19_v0  ;;  %v17_v4 = vld [vmem:[%s200_s0 + $0x8] sm:$0xff]  ;;  %142 = vmatprep.mubr.msk.f32.mxu0 %vm32_vm0, %v14_v3  ;;  %v20_v5 = vld [vmem:[%s202_s2] sm:$0xff] }
   0x3   :  { %135 = vmatpush3.msra.mxu0 %v19_v0  ;;  %24 = vperm.xlu0 %146, %v20_v5   ;;  %v16_v6 = vld [vmem:[%s200_s0] sm:$0xff]  ;;  %v21_v7 = vld [vmem:[%s202_s2 + $0x8] sm:$0xff] }
   0x4   :  { %136 = vmatprep.subr.mxu0 %v18_v1  ;;  %v15_v8 = vld [vmem:[%s201_s1 + $0x8] sm:$0xff] }
   0x5   :  { %137 = vmatpush3.msra.mxu0 %v18_v1 }
   0x6   :  { %138 = vmatprep.subr.mxu0 %v17_v4 }
   0x7   :  { %139 = vmatpush3.msra.mxu0 %v17_v4  ;;  %29 = vperm.xlu0 %146, %v21_v7  }
   0x8   :  { %140 = vmatprep.subr.mxu0 %v16_v6 }
   0x9   :  { %141 = vmatpush3.msra.mxu0 %v16_v6 }
   0xa   :  { %143 = vmatmul.mubr.msk.f32.vlgmr.msra.gmra.mxu0 %vm32_vm0, %v15_v8 }
  0x7e   :  { %v25_v9 = vpop.permute.xlu0 %24 }
  0x82   :  { %v30_v10 = vpop.permute.xlu0 %29 }
  0xca   :  { %v144_v11 = vpop.f32.mrf.mxu0 }
  0xcb   :  { %v111_v12 = vadd.f32 %v144_v11, %v30_v10 }
  0xcc   :  { %v105_v13 = vpop.f32.mrf.mxu0 }
  0xcd   :  { %vm115_vm1 = vcmp.ge.f32.partialorder %v111_v12, 0.0  ;;  %v117_v14 = vmul.f32 0.1, %v111_v12  ;;  %v106_v15 = vadd.f32 %v105_v13, %v25_v9 }
  0xcf   :  { %v119_v16 = vsel %vm115_vm1, %v111_v12, %v117_v14  ;;  %vm114_vm2 = vcmp.ge.f32.partialorder %v106_v15, 0.0  ;;  %v116_v17 = vmul.f32 0.1, %v106_v15 }
  0xd0   :  { %121 = vst [vmem:[%s203_s3 + $0x8] sm:$0xff] %v119_v16 }
  0xd1   :  { %v118_v18 = vsel %vm114_vm2, %v106_v15, %v116_v17 }
  0xd2   :  { %120 = vst [vmem:[%s203_s3] sm:$0xff] %v118_v18 }

// kernel: upsample_module_forward.9
= control target key start
LH: loop header
LB: loop body
LE: loop exit
PB: predicated region body
PF: predicated region fallthrough
CT: control target
= control target key end

     0   :  { %s769_s18 = smov 0   ;;  %s771_s19 = smov 0   ;;  %s873_s0 = inlined_call_operand.vmem [shape: f32[16,128], index: 0, kind: input, shape index: {}]   ;;  %s874_s1 = inlined_call_operand.vmem [shape: f32[16,512], index: 1, kind: input, shape index: {}]   ;;  %s875_s2 = inlined_call_operand.vmem [shape: f32[16,16], index: 2, kind: input, shape index: {}]   ;;  %s876_s3 = inlined_call_operand.vmem [shape: f32[16,16], index: 3, kind: input, shape index: {}]   ;;  %s877_s4 = inlined_call_operand.vmem [shape: f32[16,1], index: 4, kind: input, shape index: {}]   ;;  %s878_s5 = inlined_call_operand.vmem [shape: f32[16,512], index: 5, kind: output, shape index: {}]  }
   0x1   :  { %s773_s20 = smov 0   ;;  %s775_s21 = smov 0  }
   0x2   :  { %s777_s22 = smov 0  }
   0x3 LB: > { %s24_s23 = sadd.s32 1, %s732_s21  ;;  %s616_s24 = sadd.s32 4294967295, %s736_s22   ;;  %s736_s22 = sphi %s777_s22, %s15_s22   ;;  %s732_s21 = sphi %s775_s21, %s883_s21   ;;  %s728_s20 = sphi %s773_s20, %s882_s20   ;;  %s724_s19 = sphi %s771_s19, %s881_s19   ;;  %s720_s18 = sphi %s769_s18, %s880_s18  }
   0x4   : > { %p25_p0 = scmp.ge.s32.totalorder %s24_s23, 4  ;;  %p69_p1 = scmp.ne.s32.totalorder %s724_s19, %s720_s18 }
   0x5   : > { %p70_p2 = scmp.eq.s32.totalorder %s736_s22, 0  ;;  %p164_p4 = scmp.eq.s32.totalorder %s616_s24, 3 }
   0x6   : > { %s885_s23 = smov (%p25_p0, %s24_s23), 0  ;;  %s62_s26 = sadd.s32 1, %s724_s19 }
   0x7   : > { %p71_p3 = por %p70_p2, %p69_p1  ;;  %s59_s25 = ssub.s32 %s732_s21, %s885_s23 }
   0x8   : > { %p60_p5 = scmp.eq.s32.totalorder %s59_s25, 0  ;;  %p804_p6 = por %p164_p4, %p69_p1 }
   0x9   : > { %p620_p7 = scmp.ge.s32.totalorder %s736_s22, 4 }
   0xa   : > { %s809_s28 = scalar_select %p60_p5, %s724_s19, %s62_s26  }
   0xb   : > { %202 = sbr.rel (%p620_p7) target bundleno = 22 (0x16), region = 32 }
  0x10   : > { %205 = sbr.rel (!%p71_p3) target bundleno = 22 (0x16), region = 36  ;;  %s207_s29 = sand.u32 (%p71_p3), 1, %s724_s19  }
  0x11   : > { %s622_s30 = sshll.u32 (%p71_p3), %s732_s21, 3  ;;  %s621_s6 = sshll.u32 (%p71_p3), %s207_s29, 4 }
  0x12   : > { %s212_s9 = scalar_lea.vmem (%p71_p3), %s874_s1, %s622_s30  ;;  %s209_s10 = scalar_lea.vmem (%p71_p3), [#allocation2], %s621_s6 }
  0x13   : > { %v243_v0 = vld [vmem:[%s212_s9] sm:$0xff] (%p71_p3) }
  0x14   : > { %v245_v1 = vld [vmem:[%s212_s9 + $0x20] sm:$0xff] (%p71_p3)  ;;  %244 = vst [vmem:[%s209_s10] sm:$0xff] (%p71_p3), %v243_v0 }
  0x15   : > { %246 = vst [vmem:[%s209_s10 + $0x8] sm:$0xff] %v245_v1 }
  0x16 PF: > { %p623_p8 = scmp.ge.s32.totalorder %s736_s22, 1  ;;  %p251_p9 = scmp.lt.s32.totalorder %s736_s22, 5 }
  0x18   : > { %p252_p10 = pnand %p623_p8, %p251_p9 }
  0x19   : > { %s258_s13 = sand.u32 (!%p252_p10), 1, %s720_s18  }
  0x1a   : > { %255 = sbr.rel (%p252_p10) target bundleno = 250 (0xfa), region = 74  ;;  %s829_s24 = sshll.u32 (!%p252_p10), %s258_s13, 4 }
  0x1b   : > { %s260_s30 = scalar_lea.vmem (!%p252_p10), [#allocation2], %s829_s24  ;;  %s287_s12 = scalar_lea.vmem (!%p252_p10), [#allocation3], %s829_s24 }
  0x1f   : > { %v297_v2 = vld [vmem:[%s873_s0 + $0x8] sm:$0xff]  ;;  %v296_v3 = vld [vmem:[%s873_s0] sm:$0xff]  ;;  %vm302_vm0 = vcmask 130048   ;;  %v738_v9 = vmov 0   ;;  %s631_s13 = sshll.u32 (%p804_p6), %s728_s20, 3 }
  0x20   : > { %v294_v4 = vld [vmem:[%s875_s2] sm:$0xff]  ;;  %649 = vmatprep.subr.mxu1 %v297_v2  ;;  %v295_v6 = vld [vmem:[%s875_s2 + $0x8] sm:$0xff]  ;;  %697 = vset.pattern.permute.xlu0 %v738_v9  ;;  %s496_s16 = scalar_lea.vmem (%p804_p6), %s878_s5, %s631_s13 }
  0x21   : > { %653 = vmatprep.mubr.msk.f32.mxu1 %vm302_vm0, %v294_v4  ;;  %v298_v5 = vld [vmem:[%s876_s3] sm:$0xff]  ;;  %650 = vmatpush3.msra.mxu1 %v297_v2  ;;  %v301_v7 = vld [vmem:[%s260_s30 + $0x8] sm:$0xff] }
  0x22   : > { %646 = vmatprep.mubr.msk.f32.mxu0 %vm302_vm0, %v298_v5  ;;  %651 = vmatprep.subr.mxu1 %v296_v3  ;;  %v300_v8 = vld [vmem:[%s260_s30] sm:$0xff]  ;;  %v299_v11 = vld [vmem:[%s876_s3 + $0x8] sm:$0xff] }
  0x23   : > { %v465_v10 = vld [vmem:[%s877_s4] sm:$0xff]  ;;  %642 = vmatprep.subr.mxu0 %v301_v7  ;;  %652 = vmatpush3.msra.mxu1 %v296_v3  ;;  %v466_v12 = vld [vmem:[%s877_s4 + $0x8] sm:$0xff] }
  0x24   : > { %643 = vmatpush3.msra.mxu0 %v301_v7  ;;  %654 = vmatmul.mubr.msk.f32.vlgmr.msra.gmra.mxu1 %vm302_vm0, %v295_v6 }
  0x25   : > { %644 = vmatprep.subr.mxu0 %v300_v8  ;;  %469 = vperm.xlu0 %697, %v465_v10  }
  0x26   : > { %645 = vmatpush3.msra.mxu0 %v300_v8 }
  0x27   : > { %647 = vmatmul.mubr.msk.f32.vlgmr.msra.gmra.mxu0 %vm302_vm0, %v299_v11 }
  0x29   : > { %474 = vperm.xlu0 %697, %v466_v12  }
  0xa0   : > { %v470_v13 = vpop.permute.xlu0 %469 }
  0xa4   : > { %v475_v16 = vpop.permute.xlu0 %474 }
  0xe4   : > { %v655_v14 = vpop.f32.mrf.mxu1 }
  0xe6   : > { %v456_v18 = vpop.f32.mrf.mxu1 }
  0xe7   : > { %v648_v15 = vpop.f32.mrf.mxu0 }
  0xe8   : > { %v462_v17 = vadd.f32 %v655_v14, %v648_v15 }
  0xe9   : > { %v375_v19 = vpop.f32.mrf.mxu0 }
  0xea   : > { %v478_v20 = vadd.f32 %v475_v16, %v462_v17  ;;  %v457_v21 = vadd.f32 %v456_v18, %v375_v19 }
  0xec   : > { %vm480_vm1 = vcmp.ge.f32.partialorder %v478_v20, 0.0  ;;  %v482_v22 = vmul.f32 0.1, %v478_v20  ;;  %v477_v23 = vadd.f32 %v470_v13, %v457_v21 }
  0xed   : > { %493 = sbr.rel (!%p804_p6) target bundleno = 250 (0xfa), region = 82 }
  0xee   : > { %v484_v24 = vsel %vm480_vm1, %v478_v20, %v482_v22  ;;  %vm479_vm2 = vcmp.ge.f32.partialorder %v477_v23, 0.0  ;;  %v481_v25 = vmul.f32 0.1, %v477_v23 }
  0xef   : > { %486 = vst [vmem:[%s287_s12 + $0x8] sm:$0xff] %v484_v24 }
  0xf0   : > { %v483_v26 = vsel %vm479_vm2, %v477_v23, %v481_v25 }
  0xf1   : > { %485 = vst [vmem:[%s287_s12] sm:$0xff] %v483_v26 }
  0xf6   : > { %v529_v28 = vld [vmem:[%s287_s12 + $0x8] sm:$0xff] }
  0xf7   : > { %530 = vst [vmem:[%s496_s16 + $0x20] sm:$0xff] %v529_v28 }
  0xf8   : > { %v527_v27 = vld [vmem:[%s287_s12] sm:$0xff] }
  0xf9   : > { %528 = vst [vmem:[%s496_s16] sm:$0xff] %v527_v27 }
  0xfa PF: > { %s15_s22 = sadd.s32 1, %s736_s22   ;;  %s880_s18 = smov %s724_s19 }
  0xfb   : > { %p12_p11 = scmp.ge.s32.totalorder %s15_s22, 6   ;;  %s881_s19 = smov %s809_s28 }
  0xfc   : > { %s882_s20 = smov %s732_s21  ;;  %s883_s21 = smov %s885_s23 }
  0xfd   :  { %14 = sbr.rel (!%p12_p11) target bundleno = 3 (0x3), region = 154 }

// kernel: upsample_module_forward.8
= control target key start
LH: loop header
LB: loop body
LE: loop exit
PB: predicated region body
PF: predicated region fallthrough
CT: control target
= control target key end

     0   :  { %v248_v3 = vmov 0.0   ;;  %vm44_vm0 = vcmask 261120   ;;  %v249_v20 = vmov 0   ;;  %s358_s0 = inlined_call_operand.vmem [shape: f32[32,512], index: 0, kind: input, shape index: {}]   ;;  %s359_s1 = inlined_call_operand.vmem [shape: f32[16,32], index: 1, kind: input, shape index: {}]   ;;  %s360_s2 = inlined_call_operand.vmem [shape: f32[16,1], index: 2, kind: input, shape index: {}]   ;;  %s361_s3 = inlined_call_operand.vmem [shape: f32[16,512], index: 3, kind: output, shape index: {}]  }
   0x1   :  { %v29_v0 = vld [vmem:[%s358_s0 + $0x68] sm:$0xff]  ;;  %v31_v1 = vld [vmem:[%s358_s0 + $0x78] sm:$0xff]  ;;  %v28_v2 = vld [vmem:[%s358_s0 + $0x60] sm:$0xff]  ;;  %115 = vmatprep.mubr.f32.mxu0 %v248_v3  ;;  %192 = vmatprep.mubr.f32.mxu1 %v248_v3 }
   0x2   :  { %75 = vmatprep.subr.mxu0 %v29_v0  ;;  %152 = vmatprep.subr.mxu1 %v31_v1  ;;  %v30_v4 = vld [vmem:[%s358_s0 + $0x70] sm:$0xff]  ;;  %v25_v5 = vld [vmem:[%s358_s0 + $0x48] sm:$0xff]  ;;  %v27_v6 = vld [vmem:[%s358_s0 + $0x58] sm:$0xff] }
   0x3   :  { %76 = vmatpush1.msra.mxu0 %v28_v2  ;;  %153 = vmatpush1.msra.mxu1 %v30_v4  ;;  %v24_v7 = vld [vmem:[%s358_s0 + $0x40] sm:$0xff]  ;;  %v26_v8 = vld [vmem:[%s358_s0 + $0x50] sm:$0xff]  ;;  %v21_v9 = vld [vmem:[%s358_s0 + $0x28] sm:$0xff] }
   0x4   :  { %77 = vmatprep.subr.mxu0 %v25_v5  ;;  %154 = vmatprep.subr.mxu1 %v27_v6  ;;  %v23_v10 = vld [vmem:[%s358_s0 + $0x38] sm:$0xff]  ;;  %v20_v11 = vld [vmem:[%s358_s0 + $0x20] sm:$0xff]  ;;  %v22_v12 = vld [vmem:[%s358_s0 + $0x30] sm:$0xff] }
   0x5   :  { %78 = vmatpush1.msra.mxu0 %v24_v7  ;;  %155 = vmatpush1.msra.mxu1 %v26_v8  ;;  %v17_v13 = vld [vmem:[%s358_s0 + $0x8] sm:$0xff]  ;;  %v19_v14 = vld [vmem:[%s358_s0 + $0x18] sm:$0xff]  ;;  %v16_v15 = vld [vmem:[%s358_s0] sm:$0xff] }
   0x6   :  { %79 = vmatprep.subr.mxu0 %v21_v9  ;;  %156 = vmatprep.subr.mxu1 %v23_v10  ;;  %v18_v16 = vld [vmem:[%s358_s0 + $0x10] sm:$0xff]  ;;  %v14_v17 = vld [vmem:[%s359_s1] sm:$0xff]  ;;  %v15_v19 = vld [vmem:[%s359_s1 + $0x8] sm:$0xff] }
   0x7   :  { %80 = vmatpush1.msra.mxu0 %v20_v11  ;;  %157 = vmatpush1.msra.mxu1 %v22_v12  ;;  %v32_v18 = vld [vmem:[%s360_s2] sm:$0xff]  ;;  %v33_v21 = vld [vmem:[%s360_s2 + $0x8] sm:$0xff] }
   0x8   :  { %81 = vmatprep.subr.mxu0 %v17_v13  ;;  %158 = vmatprep.subr.mxu1 %v19_v14 }
   0x9   :  { %82 = vmatpush1.msra.mxu0 %v16_v15  ;;  %159 = vmatpush1.msra.mxu1 %v18_v16 }
   0xa   :  { %241 = vmatmul.mubr.msk.f32.vlgmr.msra.gmra.mxu0 %vm44_vm0, %v14_v17  ;;  %243 = vmatmul.mubr.msk.f32.vlgmr.msra.gmra.mxu1 %vm44_vm0, %v14_v17 }
   0xb   :  { %121 = vmatprep.mubr.f32.mxu0 %v248_v3  ;;  %198 = vmatprep.mubr.f32.mxu1 %v248_v3 }
   0xc   :  { %247 = vset.pattern.permute.xlu0 %v249_v20 }
   0xd   :  { %36 = vperm.xlu0 %247, %v32_v18  }
   0xe   :  { %242 = vmatmul.mubr.msk.f32.gmra.mxu0 %vm44_vm0, %v15_v19  ;;  %244 = vmatmul.mubr.msk.f32.gmra.mxu1 %vm44_vm0, %v15_v19 }
  0x11   :  { %41 = vperm.xlu0 %247, %v33_v21  }
  0x88   :  { %v37_v22 = vpop.permute.xlu0 %36 }
  0x8c   :  { %v42_v31 = vpop.permute.xlu0 %41 }
  0xca   :  { %v117_v23 = vpop.f32.mrf.mxu0  ;;  %v194_v24 = vpop.f32.mrf.mxu1 }
  0xcb   :  { %v118_v25 = vadd.f32 %v117_v23, %v37_v22  ;;  %v195_v26 = vadd.f32 %v194_v24, %v37_v22 }
  0xcc   :  { %v119_v27 = vpop.f32.mrf.mxu0  ;;  %v196_v28 = vpop.f32.mrf.mxu1 }
  0xcd   :  { %vm205_vm1 = vcmp.ge.f32.partialorder %v118_v25, 0.0  ;;  %v213_v29 = vmul.f32 0.1, %v118_v25  ;;  %vm207_vm2 = vcmp.ge.f32.partialorder %v195_v26, 0.0  ;;  %v215_v30 = vmul.f32 0.1, %v195_v26 }
  0xce   :  { %v120_v32 = vadd.f32 %v119_v27, %v37_v22  ;;  %v197_v33 = vadd.f32 %v196_v28, %v37_v22  ;;  %v123_v34 = vpop.f32.mrf.mxu0  ;;  %v200_v35 = vpop.f32.mrf.mxu1 }
  0xcf   :  { %v221_v36 = vsel %vm205_vm1, %v118_v25, %v213_v29  ;;  %v223_v37 = vsel %vm207_vm2, %v195_v26, %v215_v30  ;;  %v124_v38 = vadd.f32 %v123_v34, %v42_v31  ;;  %v201_v39 = vadd.f32 %v200_v35, %v42_v31 }
  0xd0   :  { %229 = vst [vmem:[%s361_s3] sm:$0xff] %v221_v36  ;;  %231 = vst [vmem:[%s361_s3 + $0x10] sm:$0xff] %v223_v37  ;;  %vm206_vm3 = vcmp.ge.f32.partialorder %v120_v32, 0.0  ;;  %v214_v40 = vmul.f32 0.1, %v120_v32  ;;  %vm208_vm4 = vcmp.ge.f32.partialorder %v197_v33, 0.0  ;;  %v125_v42 = vpop.f32.mrf.mxu0  ;;  %v202_v43 = vpop.f32.mrf.mxu1 }
  0xd1   :  { %v216_v41 = vmul.f32 0.1, %v197_v33  ;;  %vm209_vm5 = vcmp.ge.f32.partialorder %v124_v38, 0.0  ;;  %v217_v44 = vmul.f32 0.1, %v124_v38  ;;  %vm211_vm6 = vcmp.ge.f32.partialorder %v201_v39, 0.0 }
  0xd2   :  { %v219_v45 = vmul.f32 0.1, %v201_v39  ;;  %v222_v46 = vsel %vm206_vm3, %v120_v32, %v214_v40  ;;  %v126_v48 = vadd.f32 %v125_v42, %v42_v31  ;;  %v203_v49 = vadd.f32 %v202_v43, %v42_v31 }
  0xd3   :  { %v224_v47 = vsel %vm208_vm4, %v197_v33, %v216_v41  ;;  %230 = vst [vmem:[%s361_s3 + $0x8] sm:$0xff] %v222_v46  ;;  %v225_v50 = vsel %vm209_vm5, %v124_v38, %v217_v44 }
  0xd4   :  { %232 = vst [vmem:[%s361_s3 + $0x18] sm:$0xff] %v224_v47  ;;  %v227_v51 = vsel %vm211_vm6, %v201_v39, %v219_v45  ;;  %233 = vst [vmem:[%s361_s3 + $0x20] sm:$0xff] %v225_v50  ;;  %vm210_vm7 = vcmp.ge.f32.partialorder %v126_v48, 0.0  ;;  %v218_v52 = vmul.f32 0.1, %v126_v48  ;;  %vm212_vm8 = vcmp.ge.f32.partialorder %v203_v49, 0.0 }
  0xd5   :  { %235 = vst [vmem:[%s361_s3 + $0x30] sm:$0xff] %v227_v51  ;;  %v220_v53 = vmul.f32 0.1, %v203_v49 }
  0xd6   :  { %v226_v54 = vsel %vm210_vm7, %v126_v48, %v218_v52 }
  0xd7   :  { %v228_v55 = vsel %vm212_vm8, %v203_v49, %v220_v53  ;;  %234 = vst [vmem:[%s361_s3 + $0x28] sm:$0xff] %v226_v54 }
  0xd8   :  { %236 = vst [vmem:[%s361_s3 + $0x38] sm:$0xff] %v228_v55 }

// kernel: upsample_module_forward.10
= control target key start
LH: loop header
LB: loop body
LE: loop exit
PB: predicated region body
PF: predicated region fallthrough
CT: control target
= control target key end

     0   :  { %s1869_s18 = smov 0   ;;  %s1871_s19 = smov 0   ;;  %s2116_s0 = inlined_call_operand.vmem [shape: f32[2,18,16,18], index: 0, kind: input, shape index: {}, may-alias: {0,1,2}]   ;;  %s2117_s1 = inlined_call_operand.vmem [shape: f32[2,18,16,18], index: 1, kind: input, shape index: {}, may-alias: {0,1,2}]   ;;  %s2118_s2 = inlined_call_operand.vmem [shape: f32[2,18,16,18], index: 2, kind: input, shape index: {}, may-alias: {0,1,2}]   ;;  %s2119_s3 = inlined_call_operand.vmem [shape: f32[3,3,32,16], index: 3, kind: input, shape index: {}]   ;;  %s2120_s4 = inlined_call_operand.vmem [shape: f32[32,1], index: 4, kind: input, shape index: {}]   ;;  %s2121_s5 = inlined_call_operand.vmem [shape: f32[2,16,32,16], index: 5, kind: output, shape index: {}]  }
   0x1   :  { %s1873_s20 = smov 0   ;;  %s1875_s21 = smov 0  }
   0x2   :  { %s1877_s22 = smov 0  }
   0x3 LB: > { %s24_s23 = sadd.s32 1, %s1826_s20  ;;  %s27_s24 = sadd.s32 1, %s1830_s21  ;;  %s1834_s22 = sphi %s1877_s22, %s15_s22   ;;  %s1830_s21 = sphi %s1875_s21, %s2125_s21   ;;  %s1826_s20 = sphi %s1873_s20, %s2124_s20   ;;  %s1822_s19 = sphi %s1871_s19, %s2123_s19   ;;  %s1818_s18 = sphi %s1869_s18, %s2122_s18  }
   0x4   : > { %p25_p0 = scmp.ge.s32.totalorder %s24_s23, 16  ;;  %p1522_p1 = scmp.ge.s32.totalorder %s1834_s22, 1 }
   0x5   : > { %p247_p2 = scmp.lt.s32.totalorder %s1834_s22, 33 }
   0x6   : > { %s2127_s23 = smov (%p25_p0, %s24_s23), 0  ;;  %s2129_s24 = smov (!%p25_p0, %s27_s24), %s1830_s21 }
   0x7   : > { %p248_p3 = pnand %p1522_p1, %p247_p2  ;;  %p29_p4 = scmp.ge.s32.totalorder %s2129_s24, 2 }
   0x8   : > { %p303_p5 = scmp.lt.s32.totalorder (!%p248_p3), %s1822_s19, 1  ;;  %p305_p6 = scmp.lt.s32.totalorder (!%p248_p3), %s1818_s18, 17 }
   0x9   : > { %s2131_s24 = smov (%p29_p4, %s2129_s24), 0  ;;  %251 = sbr.rel (%p248_p3) target bundleno = 384 (0x180), region = 40 }
   0xa   : > { %s312_s6 = sadd.s32 (!%p248_p3), 1, %s1818_s18  ;;  %s323_s9 = sadd.s32 (!%p248_p3), 2, %s1818_s18 }
   0xb   : > { %p315_p7 = scmp.lt.s32.totalorder (!%p248_p3), %s312_s6, 17  ;;  %p326_p8 = scmp.lt.s32.totalorder (!%p248_p3), %s323_s9, 17 }
   0xc   : > { %s1836_s14 = smov (!%p248_p3), 127   ;;  %s1837_s15 = smov (!%p248_p3), 126  }
   0xd   : > { %p336_p9 = scmp.lt.s32.totalorder (!%p248_p3), %s1818_s18, 15 }
   0xe   : > { %v1534_v0 = vld [vmem:[%s2119_s3 + $0x30] sm:$0xff]  ;;  %vm366_vm0 = vcmask 130048   ;;  %v1532_v1 = vld [vmem:[%s2119_s3 + $0x20] sm:$0xff]  ;;  %s2133_s19 = smov (!%p303_p5, %s1822_s19), 1  ;;  %s2135_s6 = smov (!%p315_p7, %s312_s6), 17  ;;  %v1338_v8 = vld [vmem:[%s2120_s4 + $0x8] sm:$0xff] }
   0xf   : > { %1663 = vmatprep.mubr.msk.f32.mxu1 %vm366_vm0, %v1534_v0  ;;  %1660 = vmatprep.mubr.msk.f32.mxu0 %vm366_vm0, %v1532_v1  ;;  %s306_s29 = scalar_select %p305_p6, %s1818_s18, 17  ;;  %v1337_v9 = vld [vmem:[%s2120_s4] sm:$0xff]  ;;  %v1838_v10 = vmov 0   ;;  %v1339_v11 = vld [vmem:[%s2120_s4 + $0x10] sm:$0xff]  ;;  %v1340_v12 = vld [vmem:[%s2120_s4 + $0x18] sm:$0xff] }
  0x10   : > { %s1750_s30 = smul.u32 36, %s2133_s19  ;;  %s2137_s9 = smov (!%p326_p8, %s323_s9), 17  ;;  %1795 = vset.pattern.permute.xlu1 %v1838_v10  ;;  %1794 = vset.pattern.permute.xlu0 %v1838_v10  ;;  %v1535_v16 = vld [vmem:[%s2119_s3 + $0x38] sm:$0xff]  ;;  %v1533_v17 = vld [vmem:[%s2119_s3 + $0x28] sm:$0xff]  ;;  %v349_v18 = vld [vmem:[%s2119_s3] sm:$0xff] }
  0x11   : > { %s1523_s7 = sshll.u32 %s306_s29, 1  ;;  %s1525_s16 = sshll.u32 %s2135_s6, 1  ;;  %v350_v20 = vld [vmem:[%s2119_s3 + $0x8] sm:$0xff]  ;;  %v1544_v21 = vld [vmem:[%s2119_s3 + $0x40] sm:$0xff]  ;;  %v351_v24 = vld [vmem:[%s2119_s3 + $0x10] sm:$0xff] }
  0x12   : > { %s309_s8 = sadd.s32 %s1750_s30, %s1523_s7  ;;  %s319_s17 = sadd.s32 %s1750_s30, %s1525_s16  ;;  %v1545_v22 = vld [vmem:[%s2119_s3 + $0x48] sm:$0xff]  ;;  %v352_v25 = vld [vmem:[%s2119_s3 + $0x18] sm:$0xff]  ;;  %v1546_v26 = vld [vmem:[%s2119_s3 + $0x50] sm:$0xff] }
  0x13   : > { %s1524_s10 = sshll.u32 %s309_s8, 3  ;;  %s1527_s25 = sshll.u32 %s2137_s9, 1  ;;  %v1547_v27 = vld [vmem:[%s2119_s3 + $0x58] sm:$0xff]  ;;  %v1552_v30 = vld [vmem:[%s2119_s3 + $0x60] sm:$0xff]  ;;  %v1553_v31 = vld [vmem:[%s2119_s3 + $0x68] sm:$0xff] }
  0x14   : > { %s311_s13 = scalar_lea.vmem %s2116_s0, %s1524_s10  ;;  %s1526_s26 = sshll.u32 %s319_s17, 3  ;;  %v1560_v32 = vld [vmem:[%s2119_s3 + $0x80] sm:$0xff]  ;;  %v1561_v33 = vld [vmem:[%s2119_s3 + $0x88] sm:$0xff]  ;;  %v1554_v35 = vld [vmem:[%s2119_s3 + $0x70] sm:$0xff] }
  0x15   : > { %v344_v2 = vld [vmem:[%s311_s13 + $0x8] sm:$0xff]  ;;  %v343_v3 = vld [vmem:[%s311_s13] sm:$0xff]  ;;  %s321_s29 = scalar_lea.vmem %s2117_s1, %s1526_s26  ;;  %s330_s7 = sadd.s32 %s1750_s30, %s1527_s25  ;;  %v1555_v36 = vld [vmem:[%s2119_s3 + $0x78] sm:$0xff] }
  0x16   : > { %362 = vrot.lane.b32.xlu0 %v344_v2, %s1836_s14  ;;  %568 = vrot.lane.b32.xlu1 %v344_v2, %s1837_s15  ;;  %v346_v4 = vld [vmem:[%s321_s29 + $0x8] sm:$0xff]  ;;  %v1922_v5 = vld [vmem:[%s321_s29] sm:$0xff]  ;;  %s1528_s8 = sshll.u32 %s330_s7, 3  ;;  %s2139_s18 = smov (!%p336_p9, %s1818_s18), 15 }
  0x17   : > { %s332_s6 = scalar_lea.vmem %s2118_s2, %s1528_s8  ;;  %v1562_v37 = vld [vmem:[%s2119_s3 + $0x90] sm:$0xff]  ;;  %v1563_v39 = vld [vmem:[%s2119_s3 + $0x98] sm:$0xff]  ;;  %v1568_v40 = vld [vmem:[%s2119_s3 + $0xa0] sm:$0xff]  ;;  %s1529_s16 = sshll.u32 %s2139_s18, 2 }
  0x18   : > { %v1929_v6 = vld [vmem:[%s332_s6 + $0x8] sm:$0xff]  ;;  %v1931_v7 = vld [vmem:[%s332_s6] sm:$0xff]  ;;  %v1570_v46 = vld [vmem:[%s2119_s3 + $0xb0] sm:$0xff]  ;;  %s1530_s17 = sshll.u32 %s2133_s19, 6 }
  0x19   : > { %v1569_v42 = vld [vmem:[%s2119_s3 + $0xa8] sm:$0xff]  ;;  %v1576_v43 = vld [vmem:[%s2119_s3 + $0xc0] sm:$0xff]  ;;  %v1578_v47 = vld [vmem:[%s2119_s3 + $0xd0] sm:$0xff] }
  0x1a   : > { %360 = vrot.lane.b32.xlu0 %v343_v3, %s1836_s14  ;;  %566 = vrot.lane.b32.xlu1 %v343_v3, %s1837_s15  ;;  %v1577_v44 = vld [vmem:[%s2119_s3 + $0xc8] sm:$0xff]  ;;  %v1571_v48 = vld [vmem:[%s2119_s3 + $0xb8] sm:$0xff] }
  0x1b   : > { %v1579_v49 = vld [vmem:[%s2119_s3 + $0xd8] sm:$0xff]  ;;  %v1584_v51 = vld [vmem:[%s2119_s3 + $0xe0] sm:$0xff]  ;;  %v1585_v53 = vld [vmem:[%s2119_s3 + $0xe8] sm:$0xff] }
  0x1c   : > { %v1592_v52 = vld [vmem:[%s2119_s3 + $0x100] sm:$0xff]  ;;  %v1593_v54 = vld [vmem:[%s2119_s3 + $0x108] sm:$0xff]  ;;  %v1586_v55 = vld [vmem:[%s2119_s3 + $0xf0] sm:$0xff] }
  0x1d   : > { %v1594_v56 = vld [vmem:[%s2119_s3 + $0x110] sm:$0xff]  ;;  %v1587_v57 = vld [vmem:[%s2119_s3 + $0xf8] sm:$0xff] }
  0x1e   : > { %788 = vrot.lane.b32.xlu0 %v346_v4, %s1836_s14  ;;  %786 = vrot.lane.b32.xlu1 %v1922_v5, %s1836_s14  ;;  %v1595_v58 = vld [vmem:[%s2119_s3 + $0x118] sm:$0xff] }
  0x22   : > { %900 = vrot.lane.b32.xlu0 %v346_v4, %s1837_s15  ;;  %898 = vrot.lane.b32.xlu1 %v1922_v5, %s1837_s15 }
  0x26   : > { %1120 = vrot.lane.b32.xlu0 %v1929_v6, %s1836_s14  ;;  %1118 = vrot.lane.b32.xlu1 %v1931_v7, %s1836_s14  ;;  %s340_s14 = sadd.s32 %s1530_s17, %s1529_s16 }
  0x27   : > { %s1531_s25 = sshll.u32 %s340_s14, 3 }
  0x2a   : > { %1232 = vrot.lane.b32.xlu0 %v1929_v6, %s1837_s15  ;;  %1230 = vrot.lane.b32.xlu1 %v1931_v7, %s1837_s15  ;;  %s342_s15 = scalar_lea.vmem %s2121_s5, %s1531_s25 }
  0x2e   : > { %1348 = vperm.xlu1 %1795, %v1338_v8   ;;  %1343 = vperm.xlu0 %1794, %v1337_v9  }
  0x32   : > { %1353 = vperm.xlu1 %1795, %v1339_v11   ;;  %1358 = vperm.xlu0 %1794, %v1340_v12  }
  0x88   : > { %v363_v13 = vpop.permute.xlu0 %362  ;;  %v569_v14 = vpop.permute.xlu1 %568 }
  0x89   : > { %1656 = vmatprep.subr.mxu0 %v363_v13  ;;  %1746 = vmatprep.subr.mxu1 %v363_v13 }
  0x8a   : > { %1657 = vmatpush3.msra.mxu0 %v363_v13  ;;  %1748 = vmatpush3.msra.mxu1 %v363_v13 }
  0x8c   : > { %v361_v15 = vpop.permute.xlu0 %360  ;;  %v567_v19 = vpop.permute.xlu1 %566 }
  0x8d   : > { %1658 = vmatprep.subr.mxu0 %v361_v15  ;;  %1747 = vmatprep.subr.mxu1 %v361_v15 }
  0x8e   : > { %1659 = vmatpush3.msra.mxu0 %v361_v15  ;;  %1749 = vmatpush3.msra.mxu1 %v361_v15 }
  0x8f   : > { %1664 = vmatmul.mubr.msk.f32.vlgmr.msra.gmra.mxu1 %vm366_vm0, %v1535_v16  ;;  %1666 = vmatprep.subr.mxu1 %v344_v2 }
  0x90   : > { %1676 = vmatprep.subr.mxu0 %v569_v14  ;;  %1661 = vmatmul.mubr.msk.f32.vlgmr.msra.gmra.mxu0 %vm366_vm0, %v1533_v17  ;;  %v789_v23 = vpop.permute.xlu0 %788  ;;  %v787_v28 = vpop.permute.xlu1 %786 }
  0x91   : > { %1667 = vmatpush3.msra.mxu1 %v344_v2  ;;  %1677 = vmatpush3.msra.mxu0 %v569_v14 }
  0x92   : > { %1668 = vmatprep.subr.mxu1 %v343_v3  ;;  %1670 = vmatprep.mubr.msk.f32.mxu1 %vm366_vm0, %v349_v18 }
  0x93   : > { %1669 = vmatpush3.msra.mxu1 %v343_v3  ;;  %1678 = vmatprep.subr.mxu0 %v567_v19 }
  0x94   : > { %1671 = vmatmul.mubr.msk.f32.vlgmr.msra.gmra.mxu1 %vm366_vm0, %v350_v20  ;;  %1679 = vmatpush3.msra.mxu0 %v567_v19  ;;  %v901_v29 = vpop.permute.xlu0 %900  ;;  %v899_v34 = vpop.permute.xlu1 %898 }
  0x95   : > { %1680 = vmatprep.mubr.msk.f32.mxu0 %vm366_vm0, %v1544_v21  ;;  %1686 = vmatprep.subr.mxu1 %v346_v4 }
  0x96   : > { %1681 = vmatmul.mubr.msk.f32.vlgmr.msra.gmra.mxu0 %vm366_vm0, %v1545_v22  ;;  %1687 = vmatpush3.msra.mxu1 %v346_v4 }
  0x97   : > { %1696 = vmatprep.subr.mxu0 %v789_v23  ;;  %1673 = vmatprep.mubr.msk.f32.mxu1 %vm366_vm0, %v351_v24 }
  0x98   : > { %1697 = vmatpush3.msra.mxu0 %v789_v23  ;;  %1674 = vmatmul.mubr.msk.f32.gmra.mxu1 %vm366_vm0, %v352_v25  ;;  %v1121_v38 = vpop.permute.xlu0 %1120  ;;  %v1119_v41 = vpop.permute.xlu1 %1118 }
  0x99   : > { %1683 = vmatprep.mubr.msk.f32.mxu0 %vm366_vm0, %v1546_v26  ;;  %1688 = vmatprep.subr.mxu1 %v1922_v5 }
  0x9a   : > { %1684 = vmatmul.mubr.msk.f32.gmra.mxu0 %vm366_vm0, %v1547_v27  ;;  %1689 = vmatpush3.msra.mxu1 %v1922_v5 }
  0x9b   : > { %1698 = vmatprep.subr.mxu0 %v787_v28  ;;  %1690 = vmatprep.mubr.msk.f32.mxu1 %vm366_vm0, %v1552_v30 }
  0x9c   : > { %1699 = vmatpush3.msra.mxu0 %v787_v28  ;;  %1706 = vmatprep.subr.mxu1 %v901_v29  ;;  %v1233_v45 = vpop.permute.xlu0 %1232  ;;  %v1231_v50 = vpop.permute.xlu1 %1230 }
  0x9d   : > { %1691 = vmatmul.mubr.msk.f32.vlgmr.msra.gmra.mxu1 %vm366_vm0, %v1553_v31  ;;  %1700 = vmatprep.mubr.msk.f32.mxu0 %vm366_vm0, %v1560_v32 }
  0x9e   : > { %1707 = vmatpush3.msra.mxu1 %v901_v29  ;;  %1701 = vmatmul.mubr.msk.f32.vlgmr.msra.gmra.mxu0 %vm366_vm0, %v1561_v33 }
  0x9f   : > { %1716 = vmatprep.subr.mxu0 %v1929_v6  ;;  %1693 = vmatprep.mubr.msk.f32.mxu1 %vm366_vm0, %v1554_v35 }
  0xa0   : > { %1708 = vmatprep.subr.mxu1 %v899_v34  ;;  %1717 = vmatpush3.msra.mxu0 %v1929_v6 }
  0xa1   : > { %1694 = vmatmul.mubr.msk.f32.gmra.mxu1 %vm366_vm0, %v1555_v36  ;;  %1703 = vmatprep.mubr.msk.f32.mxu0 %vm366_vm0, %v1562_v37 }
  0xa2   : > { %1709 = vmatpush3.msra.mxu1 %v899_v34  ;;  %1704 = vmatmul.mubr.msk.f32.gmra.mxu0 %vm366_vm0, %v1563_v39 }
  0xa3   : > { %1718 = vmatprep.subr.mxu0 %v1931_v7  ;;  %1726 = vmatprep.subr.mxu1 %v1121_v38 }
  0xa4   : > { %1710 = vmatprep.mubr.msk.f32.mxu1 %vm366_vm0, %v1568_v40  ;;  %1719 = vmatpush3.msra.mxu0 %v1931_v7 }
  0xa5   : > { %1711 = vmatmul.mubr.msk.f32.vlgmr.msra.gmra.mxu1 %vm366_vm0, %v1569_v42  ;;  %1720 = vmatprep.mubr.msk.f32.mxu0 %vm366_vm0, %v1576_v43 }
  0xa6   : > { %1727 = vmatpush3.msra.mxu1 %v1121_v38  ;;  %1721 = vmatmul.mubr.msk.f32.vlgmr.msra.gmra.mxu0 %vm366_vm0, %v1577_v44 }
  0xa7   : > { %1728 = vmatprep.subr.mxu1 %v1119_v41  ;;  %1736 = vmatprep.subr.mxu0 %v1233_v45 }
  0xa8   : > { %1729 = vmatpush3.msra.mxu1 %v1119_v41  ;;  %1737 = vmatpush3.msra.mxu0 %v1233_v45 }
  0xa9   : > { %1713 = vmatprep.mubr.msk.f32.mxu1 %vm366_vm0, %v1570_v46  ;;  %1723 = vmatprep.mubr.msk.f32.mxu0 %vm366_vm0, %v1578_v47  ;;  %v1344_v47 = vpop.permute.xlu0 %1343 }
  0xaa   : > { %1714 = vmatmul.mubr.msk.f32.gmra.mxu1 %vm366_vm0, %v1571_v48  ;;  %1724 = vmatmul.mubr.msk.f32.gmra.mxu0 %vm366_vm0, %v1579_v49 }
  0xab   : > { %1738 = vmatprep.subr.mxu0 %v1231_v50  ;;  %1730 = vmatprep.mubr.msk.f32.mxu1 %vm366_vm0, %v1584_v51 }
  0xac   : > { %1739 = vmatpush3.msra.mxu0 %v1231_v50  ;;  %1740 = vmatprep.mubr.msk.f32.mxu0 %vm366_vm0, %v1592_v52 }
  0xae   : > { %1731 = vmatmul.mubr.msk.f32.vlgmr.msra.gmra.mxu1 %vm366_vm0, %v1585_v53  ;;  %1741 = vmatmul.mubr.msk.f32.vlgmr.msra.gmra.mxu0 %vm366_vm0, %v1593_v54  ;;  %v1349_v54 = vpop.permute.xlu1 %1348 }
  0xaf   : > { %1733 = vmatprep.mubr.msk.f32.mxu1 %vm366_vm0, %v1586_v55  ;;  %1743 = vmatprep.mubr.msk.f32.mxu0 %vm366_vm0, %v1594_v56 }
  0xb2   : > { %1734 = vmatmul.mubr.msk.f32.gmra.mxu1 %vm366_vm0, %v1587_v57  ;;  %1744 = vmatmul.mubr.msk.f32.gmra.mxu0 %vm366_vm0, %v1595_v58 }
 0x14f   : > { %v1665_v59 = vpop.f32.mrf.mxu1 }
 0x150   : > { %v1662_v60 = vpop.f32.mrf.mxu0 }
 0x151   : > { %v455_v61 = vpop.f32.mrf.mxu1 }
 0x152   : > { %v445_v62 = vpop.f32.mrf.mxu0 }
 0x154   : > { %v1672_v63 = vpop.f32.mrf.mxu1 }
 0x155   : > { %v548_v7 = vadd.f32 %v1672_v63, %v1662_v60 }
 0x156   : > { %v1682_v0 = vpop.f32.mrf.mxu0  ;;  %v542_v1 = vpop.f32.mrf.mxu1 }
 0x157   : > { %v543_v10 = vadd.f32 %v542_v1, %v445_v62  ;;  %v670_v13 = vadd.f32 %v1682_v0, %v548_v7 }
 0x158   : > { %v650_v2 = vpop.f32.mrf.mxu0  ;;  %v1675_v3 = vpop.f32.mrf.mxu1 }
 0x159   : > { %v558_v14 = vadd.f32 %v1675_v3, %v1665_v59  ;;  %v669_v17 = vadd.f32 %v650_v2, %v543_v10  ;;  %v1359_v2 = vpop.permute.xlu0 %1358 }
 0x15a   : > { %v1685_v4 = vpop.f32.mrf.mxu0  ;;  %v552_v5 = vpop.f32.mrf.mxu1 }
 0x15b   : > { %v553_v20 = vadd.f32 %v552_v5, %v455_v61  ;;  %v672_v22 = vadd.f32 %v1685_v4, %v558_v14 }
 0x15c   : > { %v660_v6 = vpop.f32.mrf.mxu0 }
 0x15d   : > { %v1692_v8 = vpop.f32.mrf.mxu1  ;;  %v671_v29 = vadd.f32 %v660_v6, %v553_v20 }
 0x15e   : > { %v1702_v9 = vpop.f32.mrf.mxu0  ;;  %v776_v18 = vadd.f32 %v1692_v8, %v670_v13 }
 0x15f   : > { %v756_v11 = vpop.f32.mrf.mxu1 }
 0x160   : > { %v870_v12 = vpop.f32.mrf.mxu0  ;;  %v775_v23 = vadd.f32 %v756_v11, %v669_v17  ;;  %v890_v26 = vadd.f32 %v1702_v9, %v776_v18  ;;  %v1354_v9 = vpop.permute.xlu1 %1353 }
 0x161   : > { %v1695_v15 = vpop.f32.mrf.mxu1 }
 0x162   : > { %v1705_v16 = vpop.f32.mrf.mxu0  ;;  %v778_v27 = vadd.f32 %v1695_v15, %v672_v22  ;;  %v889_v31 = vadd.f32 %v870_v12, %v775_v23 }
 0x163   : > { %v766_v19 = vpop.f32.mrf.mxu1 }
 0x164   : > { %v880_v21 = vpop.f32.mrf.mxu0  ;;  %v777_v33 = vadd.f32 %v766_v19, %v671_v29  ;;  %v892_v36 = vadd.f32 %v1705_v16, %v778_v27 }
 0x165   : > { %v1712_v24 = vpop.f32.mrf.mxu1 }
 0x166   : > { %v1722_v25 = vpop.f32.mrf.mxu0  ;;  %v1002_v32 = vadd.f32 %v1712_v24, %v890_v26  ;;  %v891_v42 = vadd.f32 %v880_v21, %v777_v33 }
 0x167   : > { %v982_v28 = vpop.f32.mrf.mxu1 }
 0x168   : > { %v1088_v30 = vpop.f32.mrf.mxu0  ;;  %v1001_v37 = vadd.f32 %v982_v28, %v889_v31  ;;  %v1108_v40 = vadd.f32 %v1722_v25, %v1002_v32 }
 0x16a   : > { %v1715_v34 = vpop.f32.mrf.mxu1  ;;  %v1725_v35 = vpop.f32.mrf.mxu0  ;;  %v1107_v45 = vadd.f32 %v1088_v30, %v1001_v37 }
 0x16b   : > { %v1004_v41 = vadd.f32 %v1715_v34, %v892_v36 }
 0x16c   : > { %v992_v38 = vpop.f32.mrf.mxu1  ;;  %v1098_v39 = vpop.f32.mrf.mxu0 }
 0x16d   : > { %v1003_v48 = vadd.f32 %v992_v38, %v891_v42  ;;  %v1110_v51 = vadd.f32 %v1725_v35, %v1004_v41 }
 0x16e   : > { %v1732_v43 = vpop.f32.mrf.mxu1  ;;  %v1742_v44 = vpop.f32.mrf.mxu0 }
 0x16f   : > { %v1222_v46 = vadd.f32 %v1732_v43, %v1108_v40  ;;  %v1109_v60 = vadd.f32 %v1098_v39, %v1003_v48 }
 0x170   : > { %v1202_v49 = vpop.f32.mrf.mxu1  ;;  %v1314_v50 = vpop.f32.mrf.mxu0 }
 0x171   : > { %v1334_v52 = vadd.f32 %v1742_v44, %v1222_v46  ;;  %v1221_v53 = vadd.f32 %v1202_v49, %v1107_v45 }
 0x172   : > { %v1735_v55 = vpop.f32.mrf.mxu1  ;;  %v1745_v59 = vpop.f32.mrf.mxu0 }
 0x173   : > { %v1362_v56 = vadd.f32 %v1349_v54, %v1334_v52  ;;  %v1333_v57 = vadd.f32 %v1314_v50, %v1221_v53  ;;  %v1224_v58 = vadd.f32 %v1735_v55, %v1110_v51 }
 0x174   : > { %v1212_v61 = vpop.f32.mrf.mxu1  ;;  %v1324_v5 = vpop.f32.mrf.mxu0 }
 0x175   : > { %vm1366_vm1 = vcmp.ge.f32.partialorder %v1362_v56, 0.0  ;;  %v1370_v62 = vmul.f32 0.1, %v1362_v56  ;;  %v1361_v63 = vadd.f32 %v1344_v47, %v1333_v57  ;;  %v1336_v0 = vadd.f32 %v1745_v59, %v1224_v58 }
 0x176   : > { %v1223_v1 = vadd.f32 %v1212_v61, %v1109_v60 }
 0x177   : > { %v1374_v3 = vsel %vm1366_vm1, %v1362_v56, %v1370_v62  ;;  %vm1365_vm2 = vcmp.ge.f32.partialorder %v1361_v63, 0.0  ;;  %v1369_v4 = vmul.f32 0.1, %v1361_v63  ;;  %v1364_v6 = vadd.f32 %v1359_v2, %v1336_v0 }
 0x178   : > { %1378 = vst.msk [vmem:[%s342_s15 + $0x8] sm:$0xff] %vm366_vm0, %v1374_v3  ;;  %v1335_v7 = vadd.f32 %v1324_v5, %v1223_v1 }
 0x179   : > { %v1373_v8 = vsel %vm1365_vm2, %v1361_v63, %v1369_v4  ;;  %vm1368_vm3 = vcmp.ge.f32.partialorder %v1364_v6, 0.0  ;;  %v1372_v10 = vmul.f32 0.1, %v1364_v6 }
 0x17a   : > { %1377 = vst.msk [vmem:[%s342_s15] sm:$0xff] %vm366_vm0, %v1373_v8  ;;  %v1363_v11 = vadd.f32 %v1354_v9, %v1335_v7 }
 0x17b   : > { %v1376_v12 = vsel %vm1368_vm3, %v1364_v6, %v1372_v10 }
 0x17c   : > { %vm1367_vm4 = vcmp.ge.f32.partialorder %v1363_v11, 0.0  ;;  %v1371_v13 = vmul.f32 0.1, %v1363_v11  ;;  %1380 = vst.msk [vmem:[%s342_s15 + $0x18] sm:$0xff] %vm366_vm0, %v1376_v12 }
 0x17e   : > { %v1375_v14 = vsel %vm1367_vm4, %v1363_v11, %v1371_v13 }
 0x17f   : > { %1379 = vst.msk [vmem:[%s342_s15 + $0x10] sm:$0xff] %vm366_vm0, %v1375_v14 }
 0x180 PF: > { %s15_s22 = sadd.s32 1, %s1834_s22   ;;  %s2122_s18 = smov %s1826_s20 }
 0x181   : > { %p12_p10 = scmp.ge.s32.totalorder %s15_s22, 34   ;;  %s2123_s19 = smov %s1830_s21 }
 0x182   : > { %s2124_s20 = smov %s2127_s23  ;;  %s2125_s21 = smov %s2131_s24 }
 0x183   :  { %14 = sbr.rel (!%p12_p10) target bundleno = 3 (0x3), region = 84 }

</bundles_post_ra>
